<compile_context>
chip_gen: v7x
topology: tpu7x:2x2x1
jax: 0.10.0
libtpu: 0.0.40
codegen_flags: <defaults>
</compile_context>

<pallas_src>
import numpy as np

import jax
import jax.numpy as jnp
from jax import lax
from jax.scipy import linalg as jsl
from jax.experimental import pallas as pl
from jax.experimental.pallas import tpu as pltpu


def _round_up(x: int, m: int) -> int:
    return ((x + m - 1) // m) * m


def _gram_kernel(aug_ref, gram_ref):
    """Accumulate aug^T @ aug over sample tiles into the resident output block."""
    @pl.when(pl.program_id(1) == 0)
    def _():
        gram_ref[...] = jnp.zeros_like(gram_ref)

    x = aug_ref[...]                              # (tn, m+1)
    # Contract dim 0 against dim 0: the MXU takes the contraction on the
    # sublane axis directly, no explicit (tn, m+1) -> (m+1, tn) transpose.
    gram_ref[...] += lax.dot_general(
        x, x,
        dimension_numbers=(((0,), (0,)), ((), ())),
        preferred_element_type=jnp.float32)


def augmented_gram(aug, *, max_tile=2048):
    """Pallas-computed batched Gram matrix of aug = [theta | dt].

    aug: (B, n, m1) float32  ->  (B, m1, m1) float32 with
        G[b] = aug[b]^T @ aug[b]
    Zero-pads the sample axis (exact: zero rows contribute nothing).
    """
    B, n, m1 = aug.shape

    if n <= max_tile:
        tn = _round_up(n, 8)            # single sample tile, grid of 1 step
    else:
        tn = max_tile                   # multiple of 256 (v6e/v7x MXU depth)
    n_pad = _round_up(n, tn)
    if n_pad != n:
        aug = jnp.pad(aug, ((0, 0), (0, n_pad - n), (0, 0)))

    grid = (B, n_pad // tn)

    gram = pl.pallas_call(
        _gram_kernel,
        out_shape=jax.ShapeDtypeStruct((B, m1, m1), jnp.float32),
        grid_spec=pltpu.PrefetchScalarGridSpec(
            num_scalar_prefetch=0,
            grid=grid,
            in_specs=[
                # leading batch dim squeezed out of the kernel view
                pl.BlockSpec((None, tn, m1), lambda b, k: (b, k, 0)),
            ],
            out_specs=pl.BlockSpec((None, m1, m1), lambda b, k: (b, 0, 0)),
        ),
        compiler_params=pltpu.CompilerParams(
            dimension_semantics=("parallel", "arbitrary")),
    )(aug)
    return gram


@jax.jit
def least_squares_coeffs(theta_b, dt_b):
    """Batched least-squares coefficients via the normal equations.

    theta_b: (B, n, m), dt_b: (B, n, 1)  ->  (B, m, 1)
    """
    B, n, m = theta_b.shape
    aug = jnp.concatenate(
        [theta_b.astype(jnp.float32), dt_b.astype(jnp.float32)], axis=-1)
    gram_full = augmented_gram(aug)               # (B, m+1, m+1)
    gram = gram_full[:, :m, :m]                   # theta^T theta
    xty = gram_full[:, :m, m:m + 1]               # theta^T dt

    def _solve_one(g, b):
        c = jsl.cho_factor(g, lower=True)         # Gram is SPD
        return jsl.cho_solve(c, b)

    return jax.vmap(_solve_one)(gram, xty)


class ConstraintLeastSquares:
    """JAX/Pallas port of deepymod.Constraint with LeastSquares coefficients."""

    def __init__(self):
        self.sparsity_masks = None
        self.coeff_vectors = None

    def forward(self, inputs):
        time_derivs, thetas = inputs
        if self.sparsity_masks is None:
            # default: all-True mask per output (identity column selection)
            self.sparsity_masks = [jnp.ones((theta.shape[1],), dtype=bool)
                                   for theta in thetas]

        # apply_mask: drop columns exactly like theta[:, mask] in PyTorch.
        # TODO(synk): masks must be concrete here (host-side column selection);
        # a traced/dynamic mask would need a padded-column + regularizer scheme.
        sparse_thetas = []
        for theta, mask in zip(thetas, self.sparsity_masks):
            mask_np = np.asarray(mask)
            if mask_np.all():
                sparse_thetas.append(theta)
            else:
                sparse_thetas.append(theta[:, np.flatnonzero(mask_np)])

        self.coeff_vectors = self._calculate_coeffs(sparse_thetas, time_derivs)
        return self.coeff_vectors

    __call__ = forward

    @staticmethod
    def _calculate_coeffs(sparse_thetas, time_derivs):
        shapes = {t.shape for t in sparse_thetas}
        dshapes = {d.shape for d in time_derivs}
        if len(shapes) == 1 and len(dshapes) == 1:
            # batch all outputs into one pallas_call (parallel leading axis)
            theta_b = jnp.stack(sparse_thetas)     # (B, n, m)
            dt_b = jnp.stack(time_derivs)          # (B, n, 1)
            coeffs = least_squares_coeffs(theta_b, dt_b)
            return [coeffs[i] for i in range(coeffs.shape[0])]
        # heterogeneous shapes (e.g. different masks): one call per output
        return [least_squares_coeffs(t[None], d[None])[0]
                for t, d in zip(sparse_thetas, time_derivs)]


if __name__ == "__main__":
    key = jax.random.PRNGKey(0)
    n_samples, n_terms, n_outputs = 256, 12, 2

    thetas, time_derivs = [], []
    for _ in range(n_outputs):
        k1, k2, key = jax.random.split(key, 3)
        thetas.append(jax.random.normal(k1, (n_samples, n_terms),
                                        dtype=jnp.float32))
        time_derivs.append(jax.random.normal(k2, (n_samples, 1),
                                             dtype=jnp.float32))

    constraint = ConstraintLeastSquares()
    coeff_vectors = constraint((time_derivs, thetas))
    coeff_vectors = [jax.block_until_ready(c) for c in coeff_vectors]

    # sanity check against a pure-JAX reference (normal equations)
    for theta, dt, c in zip(thetas, time_derivs, coeff_vectors):
        ref = jnp.linalg.solve(theta.T @ theta, theta.T @ dt)
        assert c.shape == (n_terms, 1)
        assert jnp.allclose(c, ref, atol=1e-3, rtol=1e-3), (
            float(jnp.max(jnp.abs(c - ref))))

    print("KERNEL_OK")
</pallas_src>

<mosaic_0001>
module attributes {stable_mosaic.version = 11 : i64} {
  func.func @_gram_kernel(%arg0: i32, %arg1: i32, %arg2: memref<1x256x13xf32, #tpu.memory_space<vmem>>, %arg3: memref<1x13x13xf32, #tpu.memory_space<vmem>>) attributes {dimension_semantics = [#tpu.dimension_semantics<parallel>, #tpu.dimension_semantics<arbitrary>], iteration_bounds = array<i64: 2, 1>, scalar_prefetch = 0 : i64, scratch_operands = 0 : i64, tpu.core_type = #tpu.core_type<tc>, window_params = [{transform_indices = @transform_0, window_bounds = array<i64: 1, 256, 13>}, {transform_indices = @transform_1, window_bounds = array<i64: 1, 13, 13>}]} {
    %c0_i32 = arith.constant 0 : i32
    %0 = arith.cmpi eq, %arg1, %c0_i32 : i32
    %1 = arith.extui %0 : i1 to i32
    %c0_i32_0 = arith.constant 0 : i32
    %2 = arith.cmpi ne, %1, %c0_i32_0 : i32
    scf.if %2 {
      %cst_9 = arith.constant 0.000000e+00 : f32
      %12 = vector.broadcast %cst_9 : f32 to vector<13x13xf32>
      %c0_10 = arith.constant 0 : index
      %c0_11 = arith.constant 0 : index
      %c0_12 = arith.constant 0 : index
      %13 = vector.load %arg3[%c0_10, %c0_11, %c0_12] : memref<1x13x13xf32, #tpu.memory_space<vmem>>, vector<1x13x13xf32>
      %14 = vector.shape_cast %13 : vector<1x13x13xf32> to vector<13x13xf32>
      %15 = vector.shape_cast %12 : vector<13x13xf32> to vector<1x13x13xf32>
      tpu.vector_store %arg3[%c0_10, %c0_11, %c0_12], %15 {strides = array<i32>} : memref<1x13x13xf32, #tpu.memory_space<vmem>>, vector<1x13x13xf32>,
    } else {
    }
    %c0 = arith.constant 0 : index
    %c0_1 = arith.constant 0 : index
    %c0_2 = arith.constant 0 : index
    %3 = vector.load %arg2[%c0, %c0_1, %c0_2] : memref<1x256x13xf32, #tpu.memory_space<vmem>>, vector<1x256x13xf32>
    %4 = vector.shape_cast %3 : vector<1x256x13xf32> to vector<256x13xf32>
    %c0_3 = arith.constant 0 : index
    %c0_4 = arith.constant 0 : index
    %c0_5 = arith.constant 0 : index
    %5 = vector.load %arg3[%c0_3, %c0_4, %c0_5] : memref<1x13x13xf32, #tpu.memory_space<vmem>>, vector<1x13x13xf32>
    %6 = vector.shape_cast %5 : vector<1x13x13xf32> to vector<13x13xf32>
    %cst = arith.constant dense<0.000000e+00> : vector<13x13xf32>
    %7 = tpu.matmul %4, %4, %cst {dimension_numbers = #tpu.dot_dimension_numbers<[0], [0], [1], [1], [0, 1, 1, 1], [], []>} : vector<256x13xf32>, vector<256x13xf32>, vector<13x13xf32> -> vector<13x13xf32>
    %8 = arith.addf %6, %7 : vector<13x13xf32>
    %c0_6 = arith.constant 0 : index
    %c0_7 = arith.constant 0 : index
    %c0_8 = arith.constant 0 : index
    %9 = vector.load %arg3[%c0_6, %c0_7, %c0_8] : memref<1x13x13xf32, #tpu.memory_space<vmem>>, vector<1x13x13xf32>
    %10 = vector.shape_cast %9 : vector<1x13x13xf32> to vector<13x13xf32>
    %11 = vector.shape_cast %8 : vector<13x13xf32> to vector<1x13x13xf32>
    tpu.vector_store %arg3[%c0_6, %c0_7, %c0_8], %11 {strides = array<i32>} : memref<1x13x13xf32, #tpu.memory_space<vmem>>, vector<1x13x13xf32>,
    return
  }
  func.func @transform_0(%arg0: i32, %arg1: i32) -> (i32, i32, i32) {
    %c0_i32 = arith.constant 0 : i32
    %c0_i32_0 = arith.constant 0 : i32
    return %arg0, %arg1, %c0_i32 : i32, i32, i32
  }
  func.func @transform_1(%arg0: i32, %arg1: i32) -> (i32, i32, i32) {
    %c0_i32 = arith.constant 0 : i32
    %c0_i32_0 = arith.constant 0 : i32
    %c0_i32_1 = arith.constant 0 : i32
    return %arg0, %c0_i32, %c0_i32_0 : i32, i32, i32
  }
}

</mosaic_0001>

<bundles_post_ra>
// kernel: custom-call.6
= control target key start
LH: loop header
LB: loop body
LE: loop exit
PB: predicated region body
PF: predicated region fallthrough
CT: control target
= control target key end

     0   :  { %s742_s6 = smov 0   ;;  %s744_s7 = smov 0   ;;  %s867_s0 = inlined_call_operand.vmem [shape: f32[2,12,12], index: 0, kind: input, shape index: {}]   ;;  %s868_s1 = inlined_call_operand.vmem [shape: f32[2,12,12], index: 1, kind: output, shape index: {}]  }
   0x1   :  { %s746_s8 = smov 0  }
   0x2 LB: > { %s583_s9 = sadd.s32 4294967295, %s729_s8   ;;  %s26_s10 = sadd.s32 1, %s725_s7  ;;  %s729_s8 = sphi %s746_s8, %s7_s8   ;;  %s725_s7 = sphi %s744_s7, %s870_s7   ;;  %s721_s6 = sphi %s742_s6, %s869_s6  }
   0x3   : > { %p28_p0 = scmp.ge.s32.totalorder %s26_s10, 2  ;;  %p585_p1 = scmp.ge.s32.totalorder %s729_s8, 2 }
   0x4   : > { %s42_s11 = sand.u32 (!%p585_p1), 1, %s729_s8   ;;  %s656_s12 = sshll.u32 (!%p585_p1), %s725_s7, 4 }
   0x5   : > { %s872_s10 = smov (%p28_p0, %s26_s10), 0  ;;  %40 = sbr.rel (%p585_p1) target bundleno = 12 (0xc), region = 16 }
   0x6   : > { %s586_s13 = sshll.u32 (!%p585_p1), %s42_s11, 4  ;;  %s49_s16 = scalar_lea.vmem (!%p585_p1), %s867_s0, %s656_s12 }
   0x7   : > { %v79_v0 = vld [vmem:[%s49_s16] sm:$0xff] (!%p585_p1)  ;;  %v81_v1 = vld [vmem:[%s49_s16 + $0x8] sm:$0xff] (!%p585_p1)  ;;  %s44_s17 = scalar_lea.vmem (!%p585_p1), [#allocation0], %s586_s13 }
   0x8   : > { %80 = vst [vmem:[%s44_s17] sm:$0xff] (!%p585_p1), %v79_v0  ;;  %82 = vst [vmem:[%s44_s17 + $0x8] sm:$0xff] (!%p585_p1), %v81_v1 }
   0xc PF: > { %p589_p2 = scmp.ge.s32.totalorder %s729_s8, 1  ;;  %p87_p3 = scmp.lt.s32.totalorder %s729_s8, 3 }
   0xe   : > { %p88_p4 = pnand %p589_p2, %p87_p3 }
   0xf   : > { %s94_s18 = sand.u32 (!%p88_p4), 1, %s583_s9   ;;  %v731_v2 = vmov (!%p88_p4), 0.0   ;;  %vm108_vm0 = vcmask (!%p88_p4), 7168   ;;  %vm139_vm1 = vcmask (!%p88_p4), 15368   ;;  %vm156_vm2 = vcmask (!%p88_p4), 1047553   ;;  %s657_s22 = sshll.u32 (!%p88_p4), %s721_s6, 4 }
  0x10   : > { %91 = sbr.rel (%p88_p4) target bundleno = 2057 (0x809), region = 54  ;;  %s590_s19 = sshll.u32 (!%p88_p4), %s94_s18, 4  ;;  %vm157_vm3 = vmand (!%p88_p4), %vm139_vm1, %vm156_vm2  ;;  %vm174_vm4 = vcmask (!%p88_p4), 23568   ;;  %vm191_vm5 = vcmask (!%p88_p4), 1047554   ;;  %vm209_vm7 = vcmask (!%p88_p4), 31768   ;;  %vm226_vm8 = vcmask (!%p88_p4), 1047555  }
  0x11   : > { %s769_s20 = scalar_lea.vmem (!%p88_p4), [#allocation1], %s590_s19  ;;  %s773_s21 = scalar_lea.vmem (!%p88_p4), [#allocation0], %s590_s19  ;;  %vm192_vm6 = vmand (!%p88_p4), %vm174_vm4, %vm191_vm5  ;;  %vm244_vm10 = vcmask (!%p88_p4), 39968   ;;  %vm261_vm11 = vcmask (!%p88_p4), 1047556   ;;  %vm279_vm13 = vcmask (!%p88_p4), 48168   ;;  %vm296_vm14 = vcmask (!%p88_p4), 1047557  }
  0x12   : > { %105 = vst [vmem:[%s769_s20] sm:$0xff] (!%p88_p4), %v731_v2  ;;  %v110_v6 = vld [vmem:[%s773_s21] ss:$0 sm:$0xff] (!%p88_p4)  ;;  %v781_v15 = vld [vmem:[%s773_s21 + $0x8] sm:$0xff] (!%p88_p4)  ;;  %v597_v24 = vld [vmem:[%s773_s21 + $0x1] ss:$0 sm:$0xff] (!%p88_p4)  ;;  %s844_s25 = scalar_lea.vmem (!%p88_p4), %s868_s1, %s657_s22 }
  0x13   : > { %v777_v10 = vld [vmem:[%s773_s21] sm:$0xff] (!%p88_p4)  ;;  %vm227_vm9 = vmand (!%p88_p4), %vm209_vm7, %vm226_vm8 }
  0x14   : > { %v602_v42 = vld [vmem:[%s773_s21 + $0x2] ss:$0 sm:$0xff] (!%p88_p4)  ;;  %v607_v60 = vld [vmem:[%s773_s21 + $0x3] ss:$0 sm:$0xff] (!%p88_p4)  ;;  %vm262_vm12 = vmand (!%p88_p4), %vm244_vm10, %vm261_vm11  ;;  %vm432_vm11 = vcmask (!%p88_p4), 89168  }
  0x15   : > { %vm297_vm15 = vmand (!%p88_p4), %vm279_vm13, %vm296_vm14 }
  0x19   : > { %v109_v3 = vld [vmem:[%s769_s20] ss:$0 sm:$0xff] }
  0x1a   : > { %v111_v4 = vmul.f32 %v109_v3, %v109_v3  ;;  %v130_v5 = vmul.f32 0.0, %v109_v3 }
  0x1c   : > { %112 = vadd.xlane.f32.xlu0 %v111_v4  ;;  %131 = vadd.xlane.f32.xlu1 %v130_v5 }
  0x20   : > { %119 = vadd.xlane.f32.xlu0 %v130_v5 }
  0xa9   : > { %v113_v7 = vpop.xlane.xlu0 %112  ;;  %v132_v14 = vpop.xlane.xlu1 %131 }
  0xaa   : > { %v114_v8 = vsub.f32 %v110_v6, %v113_v7  ;;  %v133_v17 = vsub.f32 %v781_v15, %v132_v14 }
  0xac   : > { %683 = vrsqrt.f32 %v114_v8 }
  0xad   : > { %v120_v9 = vpop.xlane.xlu0 %119 }
  0xae   : > { %v121_v11 = vsub.f32 %v777_v10, %v120_v9 }
  0xb6   : > { %v684_v12 = vpop.eup %683 }
  0xb7   : > { %v122_v13 = vmul.f32 %v684_v12, %v121_v11  ;;  %v134_v18 = vmul.f32 %v684_v12, %v133_v17 }
  0xb9   : > { %v123_v16 = vsel %vm108_vm0, %v122_v13, 0.0  ;;  %v135_v19 = vsel %vm108_vm0, %v134_v18, 0.0  ;;  %vm314_vm0 = vcmask 56368  }
  0xba   : > { %125 = vst [vmem:[%s769_s20] sm:$0xff] %v123_v16 }
  0xc1   : > { %v596_v20 = vld [vmem:[%s769_s20 + $0x1] ss:$0 sm:$0xff] }
  0xc2   : > { %v151_v21 = vmul.f32 %v596_v20, %v123_v16  ;;  %v144_v22 = vmul.f32 %v596_v20, %v596_v20  ;;  %v165_v23 = vmul.f32 %v596_v20, %v135_v19 }
  0xc4   : > { %152 = vadd.xlane.f32.xlu0 %v151_v21  ;;  %145 = vadd.xlane.f32.xlu1 %v144_v22 }
  0xc8   : > { %166 = vadd.xlane.f32.xlu1 %v165_v23 }
 0x151   : > { %v146_v25 = vpop.xlane.xlu1 %145  ;;  %v153_v27 = vpop.xlane.xlu0 %152 }
 0x152   : > { %v147_v26 = vsub.f32 %v597_v24, %v146_v25  ;;  %v154_v28 = vsub.f32 %v777_v10, %v153_v27 }
 0x154   : > { %685 = vrsqrt.f32 %v147_v26 }
 0x155   : > { %v167_v33 = vpop.xlane.xlu1 %166 }
 0x156   : > { %v168_v34 = vsub.f32 %v781_v15, %v167_v33 }
 0x15e   : > { %v686_v29 = vpop.eup %685 }
 0x15f   : > { %v155_v30 = vmul.f32 %v686_v29, %v154_v28  ;;  %v169_v35 = vmul.f32 %v686_v29, %v168_v34  ;;  %v617_v34 = vld [vmem:[%s773_s21 + $0x5] ss:$0 sm:$0xff] }
 0x161   : > { %v158_v31 = vsel %vm157_vm3, %v155_v30, 0.0  ;;  %v170_v36 = vsel %vm139_vm1, %v169_v35, 0.0  ;;  %vm331_vm1 = vcmask 1047558  }
 0x162   : > { %v159_v32 = vadd.f32 %v158_v31, %v123_v16  ;;  %v171_v40 = vadd.f32 %v170_v36, %v135_v19  ;;  %v612_v16 = vld [vmem:[%s773_s21 + $0x4] ss:$0 sm:$0xff]  ;;  %vm332_vm3 = vmand %vm314_vm0, %vm331_vm1 }
 0x164   : > { %160 = vst [vmem:[%s769_s20] sm:$0xff] %v159_v32 }
 0x16b   : > { %v601_v37 = vld [vmem:[%s769_s20 + $0x2] ss:$0 sm:$0xff] }
 0x16c   : > { %v186_v38 = vmul.f32 %v601_v37, %v159_v32  ;;  %v179_v39 = vmul.f32 %v601_v37, %v601_v37  ;;  %v200_v41 = vmul.f32 %v601_v37, %v171_v40 }
 0x16e   : > { %187 = vadd.xlane.f32.xlu1 %v186_v38  ;;  %180 = vadd.xlane.f32.xlu0 %v179_v39 }
 0x172   : > { %201 = vadd.xlane.f32.xlu0 %v200_v41 }
 0x1fb   : > { %v181_v43 = vpop.xlane.xlu0 %180  ;;  %v188_v45 = vpop.xlane.xlu1 %187 }
 0x1fc   : > { %v182_v44 = vsub.f32 %v602_v42, %v181_v43  ;;  %v189_v46 = vsub.f32 %v777_v10, %v188_v45 }
 0x1fe   : > { %687 = vrsqrt.f32 %v182_v44 }
 0x1ff   : > { %v202_v51 = vpop.xlane.xlu0 %201 }
 0x200   : > { %v203_v52 = vsub.f32 %v781_v15, %v202_v51 }
 0x208   : > { %v688_v47 = vpop.eup %687 }
 0x209   : > { %v190_v48 = vmul.f32 %v688_v47, %v189_v46  ;;  %v204_v53 = vmul.f32 %v688_v47, %v203_v52  ;;  %v622_v52 = vld [vmem:[%s773_s21 + $0x6] ss:$0 sm:$0xff] }
 0x20b   : > { %v193_v49 = vsel %vm192_vm6, %v190_v48, 0.0  ;;  %v205_v54 = vsel %vm174_vm4, %v204_v53, 0.0  ;;  %vm349_vm4 = vcmask 64568   ;;  %vm384_vm6 = vcmask 72768  }
 0x20c   : > { %v194_v50 = vadd.f32 %v193_v49, %v159_v32  ;;  %v206_v58 = vadd.f32 %v205_v54, %v171_v40 }
 0x20e   : > { %195 = vst [vmem:[%s769_s20] sm:$0xff] %v194_v50 }
 0x215   : > { %v606_v55 = vld [vmem:[%s769_s20 + $0x3] ss:$0 sm:$0xff] }
 0x216   : > { %v221_v56 = vmul.f32 %v606_v55, %v194_v50  ;;  %v214_v57 = vmul.f32 %v606_v55, %v606_v55  ;;  %v235_v59 = vmul.f32 %v606_v55, %v206_v58 }
 0x218   : > { %222 = vadd.xlane.f32.xlu0 %v221_v56  ;;  %215 = vadd.xlane.f32.xlu1 %v214_v57 }
 0x21c   : > { %236 = vadd.xlane.f32.xlu1 %v235_v59 }
 0x2a5   : > { %v216_v61 = vpop.xlane.xlu1 %215  ;;  %v223_v63 = vpop.xlane.xlu0 %222 }
 0x2a6   : > { %v217_v62 = vsub.f32 %v607_v60, %v216_v61  ;;  %v224_v0 = vsub.f32 %v777_v10, %v223_v63 }
 0x2a8   : > { %689 = vrsqrt.f32 %v217_v62 }
 0x2a9   : > { %v237_v5 = vpop.xlane.xlu1 %236 }
 0x2aa   : > { %v238_v6 = vsub.f32 %v781_v15, %v237_v5  ;;  %v627_v5 = vld [vmem:[%s773_s21 + $0x7] ss:$0 sm:$0xff] }
 0x2b2   : > { %v690_v1 = vpop.eup %689 }
 0x2b3   : > { %v225_v2 = vmul.f32 %v690_v1, %v224_v0  ;;  %v239_v7 = vmul.f32 %v690_v1, %v238_v6 }
 0x2b5   : > { %v228_v3 = vsel %vm227_vm9, %v225_v2, 0.0  ;;  %v240_v8 = vsel %vm209_vm7, %v239_v7, 0.0  ;;  %vm407_vm7 = vcmask 80968  }
 0x2b6   : > { %v229_v4 = vadd.f32 %v228_v3, %v194_v50  ;;  %v241_v13 = vadd.f32 %v240_v8, %v206_v58  ;;  %vm427_vm9 = vmand %vm407_vm7, %vm156_vm2  ;;  %vm366_vm2 = vcmask 1047559  }
 0x2b8   : > { %230 = vst [vmem:[%s769_s20] sm:$0xff] %v229_v4 }
 0x2bf   : > { %v611_v9 = vld [vmem:[%s769_s20 + $0x4] ss:$0 sm:$0xff] }
 0x2c0   : > { %v256_v11 = vmul.f32 %v611_v9, %v229_v4  ;;  %v249_v12 = vmul.f32 %v611_v9, %v611_v9  ;;  %v270_v14 = vmul.f32 %v611_v9, %v241_v13 }
 0x2c2   : > { %257 = vadd.xlane.f32.xlu1 %v256_v11  ;;  %250 = vadd.xlane.f32.xlu0 %v249_v12 }
 0x2c6   : > { %271 = vadd.xlane.f32.xlu0 %v270_v14 }
 0x34f   : > { %v251_v17 = vpop.xlane.xlu0 %250  ;;  %v258_v19 = vpop.xlane.xlu1 %257 }
 0x350   : > { %v252_v18 = vsub.f32 %v612_v16, %v251_v17  ;;  %v259_v20 = vsub.f32 %v777_v10, %v258_v19  ;;  %v632_v19 = vld [vmem:[%s773_s21 + $0x8] ss:$0 sm:$0xff] }
 0x352   : > { %691 = vrsqrt.f32 %v252_v18 }
 0x353   : > { %v272_v25 = vpop.xlane.xlu0 %271 }
 0x354   : > { %v273_v26 = vsub.f32 %v781_v15, %v272_v25 }
 0x35c   : > { %v692_v21 = vpop.eup %691 }
 0x35d   : > { %v260_v22 = vmul.f32 %v692_v21, %v259_v20  ;;  %v274_v27 = vmul.f32 %v692_v21, %v273_v26 }
 0x35f   : > { %v263_v23 = vsel %vm262_vm12, %v260_v22, 0.0  ;;  %v275_v28 = vsel %vm244_vm10, %v274_v27, 0.0  ;;  %vm367_vm10 = vmand %vm349_vm4, %vm366_vm2 }
 0x360   : > { %v264_v24 = vadd.f32 %v263_v23, %v229_v4  ;;  %v276_v32 = vadd.f32 %v275_v28, %v241_v13  ;;  %vm452_vm12 = vmand %vm432_vm11, %vm191_vm5 }
 0x362   : > { %265 = vst [vmem:[%s769_s20] sm:$0xff] %v264_v24 }
 0x369   : > { %v616_v29 = vld [vmem:[%s769_s20 + $0x5] ss:$0 sm:$0xff] }
 0x36a   : > { %v291_v30 = vmul.f32 %v616_v29, %v264_v24  ;;  %v284_v31 = vmul.f32 %v616_v29, %v616_v29  ;;  %v305_v33 = vmul.f32 %v616_v29, %v276_v32 }
 0x36c   : > { %292 = vadd.xlane.f32.xlu0 %v291_v30  ;;  %285 = vadd.xlane.f32.xlu1 %v284_v31  ;;  %v637_v31 = vld [vmem:[%s773_s21 + $0x9] ss:$0 sm:$0xff] }
 0x370   : > { %306 = vadd.xlane.f32.xlu1 %v305_v33 }
 0x3f9   : > { %v286_v35 = vpop.xlane.xlu1 %285  ;;  %v293_v37 = vpop.xlane.xlu0 %292 }
 0x3fa   : > { %v287_v36 = vsub.f32 %v617_v34, %v286_v35  ;;  %v294_v38 = vsub.f32 %v777_v10, %v293_v37 }
 0x3fc   : > { %693 = vrsqrt.f32 %v287_v36 }
 0x3fd   : > { %v307_v43 = vpop.xlane.xlu1 %306 }
 0x3fe   : > { %v308_v44 = vsub.f32 %v781_v15, %v307_v43 }
 0x406   : > { %v694_v39 = vpop.eup %693 }
 0x407   : > { %v295_v40 = vmul.f32 %v694_v39, %v294_v38  ;;  %v309_v45 = vmul.f32 %v694_v39, %v308_v44  ;;  %v642_v44 = vld [vmem:[%s773_s21 + $0xa] ss:$0 sm:$0xff] }
 0x409   : > { %v298_v41 = vsel %vm297_vm15, %v295_v40, 0.0  ;;  %v310_v46 = vsel %vm279_vm13, %v309_v45, 0.0  ;;  %vm457_vm13 = vcmask 97368  }
 0x40a   : > { %v299_v42 = vadd.f32 %v298_v41, %v264_v24  ;;  %v311_v50 = vadd.f32 %v310_v46, %v276_v32  ;;  %vm477_vm5 = vmand %vm457_vm13, %vm226_vm8 }
 0x40c   : > { %300 = vst [vmem:[%s769_s20] sm:$0xff] %v299_v42 }
 0x413   : > { %v621_v47 = vld [vmem:[%s769_s20 + $0x6] ss:$0 sm:$0xff] }
 0x414   : > { %v326_v48 = vmul.f32 %v621_v47, %v299_v42  ;;  %v319_v49 = vmul.f32 %v621_v47, %v621_v47  ;;  %v340_v51 = vmul.f32 %v621_v47, %v311_v50 }
 0x416   : > { %327 = vadd.xlane.f32.xlu1 %v326_v48  ;;  %320 = vadd.xlane.f32.xlu0 %v319_v49 }
 0x41a   : > { %341 = vadd.xlane.f32.xlu0 %v340_v51 }
 0x4a3   : > { %v321_v53 = vpop.xlane.xlu0 %320  ;;  %v328_v55 = vpop.xlane.xlu1 %327 }
 0x4a4   : > { %v322_v54 = vsub.f32 %v622_v52, %v321_v53  ;;  %v329_v56 = vsub.f32 %v777_v10, %v328_v55 }
 0x4a6   : > { %695 = vrsqrt.f32 %v322_v54 }
 0x4a7   : > { %v342_v58 = vpop.xlane.xlu0 %341 }
 0x4a8   : > { %v343_v61 = vsub.f32 %v781_v15, %v342_v58 }
 0x4b0   : > { %v696_v57 = vpop.eup %695 }
 0x4b1   : > { %v330_v59 = vmul.f32 %v696_v57, %v329_v56  ;;  %v344_v63 = vmul.f32 %v696_v57, %v343_v61 }
 0x4b3   : > { %v333_v60 = vsel %vm332_vm3, %v330_v59, 0.0  ;;  %v345_v0 = vsel %vm314_vm0, %v344_v63, 0.0 }
 0x4b4   : > { %v817_v62 = vadd.f32 %v333_v60, %v299_v42  ;;  %v346_v1 = vadd.f32 %v345_v0, %v311_v50  ;;  %v647_v60 = vld [vmem:[%s773_s21 + $0xb] ss:$0 sm:$0xff] }
 0x4b6   : > { %335 = vst [vmem:[%s769_s20] sm:$0xff] %v817_v62 }
 0x4bd   : > { %v626_v2 = vld [vmem:[%s769_s20 + $0x7] ss:$0 sm:$0xff] }
 0x4be   : > { %v375_v3 = vmul.f32 %v626_v2, %v346_v1  ;;  %v354_v4 = vmul.f32 %v626_v2, %v626_v2  ;;  %v361_v43 = vmul.f32 %v626_v2, %v817_v62 }
 0x4c0   : > { %376 = vadd.xlane.f32.xlu0 %v375_v3  ;;  %355 = vadd.xlane.f32.xlu1 %v354_v4 }
 0x54d   : > { %v356_v6 = vpop.xlane.xlu1 %355  ;;  %v377_v8 = vpop.xlane.xlu0 %376 }
 0x54e   : > { %v357_v7 = vsub.f32 %v627_v5, %v356_v6  ;;  %v378_v9 = vsub.f32 %v781_v15, %v377_v8 }
 0x550   : > { %697 = vrsqrt.f32 %v357_v7 }
 0x55a   : > { %v698_v11 = vpop.eup %697 }
 0x55b   : > { %v379_v12 = vmul.f32 %v698_v11, %v378_v9 }
 0x55d   : > { %v380_v13 = vsel %vm349_vm4, %v379_v12, 0.0 }
 0x55e   : > { %v381_v14 = vadd.f32 %v380_v13, %v346_v1 }
 0x560   : > { %630 = vst [vmem:[%s769_s20 + $0x8] sm:$0xff] %v381_v14 }
 0x567   : > { %v631_v16 = vld [vmem:[%s769_s20 + $0x8] ss:$0 sm:$0xff] }
 0x568   : > { %v398_v17 = vmul.f32 %v631_v16, %v381_v14  ;;  %v389_v18 = vmul.f32 %v631_v16, %v631_v16 }
 0x56a   : > { %399 = vadd.xlane.f32.xlu0 %v398_v17  ;;  %390 = vadd.xlane.f32.xlu1 %v389_v18 }
 0x5f7   : > { %v391_v20 = vpop.xlane.xlu1 %390  ;;  %v400_v22 = vpop.xlane.xlu0 %399 }
 0x5f8   : > { %v392_v21 = vsub.f32 %v632_v19, %v391_v20  ;;  %v401_v23 = vsub.f32 %v781_v15, %v400_v22 }
 0x5fa   : > { %699 = vrsqrt.f32 %v392_v21 }
 0x604   : > { %v700_v24 = vpop.eup %699 }
 0x605   : > { %v402_v25 = vmul.f32 %v700_v24, %v401_v23 }
 0x607   : > { %v403_v26 = vsel %vm384_vm6, %v402_v25, 0.0 }
 0x608   : > { %v404_v27 = vadd.f32 %v403_v26, %v381_v14 }
 0x60a   : > { %635 = vst [vmem:[%s769_s20 + $0x8] sm:$0xff] %v404_v27 }
 0x611   : > { %v636_v28 = vld [vmem:[%s769_s20 + $0x9] ss:$0 sm:$0xff] }
 0x612   : > { %v421_v29 = vmul.f32 %v636_v28, %v404_v27  ;;  %v412_v30 = vmul.f32 %v636_v28, %v636_v28 }
 0x614   : > { %422 = vadd.xlane.f32.xlu0 %v421_v29  ;;  %413 = vadd.xlane.f32.xlu1 %v412_v30 }
 0x6a1   : > { %v414_v32 = vpop.xlane.xlu1 %413  ;;  %v423_v34 = vpop.xlane.xlu0 %422 }
 0x6a2   : > { %v415_v33 = vsub.f32 %v637_v31, %v414_v32  ;;  %v424_v35 = vsub.f32 %v781_v15, %v423_v34 }
 0x6a4   : > { %701 = vrsqrt.f32 %v415_v33 }
 0x6ae   : > { %v702_v36 = vpop.eup %701 }
 0x6af   : > { %v425_v37 = vmul.f32 %v702_v36, %v424_v35 }
 0x6b1   : > { %v428_v38 = vsel %vm427_vm9, %v425_v37, 0.0 }
 0x6b2   : > { %v429_v39 = vadd.f32 %v428_v38, %v404_v27 }
 0x6b4   : > { %640 = vst [vmem:[%s769_s20 + $0x8] sm:$0xff] %v429_v39 }
 0x6bb   : > { %v641_v40 = vld [vmem:[%s769_s20 + $0xa] ss:$0 sm:$0xff] }
 0x6bc   : > { %v446_v41 = vmul.f32 %v641_v40, %v429_v39  ;;  %v437_v42 = vmul.f32 %v641_v40, %v641_v40 }
 0x6be   : > { %447 = vadd.xlane.f32.xlu0 %v446_v41  ;;  %438 = vadd.xlane.f32.xlu1 %v437_v42 }
 0x6c2   : > { %362 = vadd.xlane.f32.xlu0 %v361_v43 }
 0x74b   : > { %v448_v45 = vpop.xlane.xlu0 %447  ;;  %v439_v46 = vpop.xlane.xlu1 %438 }
 0x74c   : > { %v440_v47 = vsub.f32 %v642_v44, %v439_v46  ;;  %v449_v53 = vsub.f32 %v781_v15, %v448_v45 }
 0x74e   : > { %703 = vrsqrt.f32 %v440_v47 }
 0x74f   : > { %v363_v48 = vpop.xlane.xlu0 %362 }
 0x750   : > { %v364_v49 = vsub.f32 %v777_v10, %v363_v48 }
 0x752   : > { %v365_v50 = vmul.f32 %v698_v11, %v364_v49 }
 0x754   : > { %v368_v51 = vsel %vm367_vm10, %v365_v50, 0.0 }
 0x755   : > { %v369_v52 = vadd.f32 %v368_v51, %v817_v62 }
 0x757   : > { %370 = vst [vmem:[%s769_s20] sm:$0xff] %v369_v52  ;;  %521 = vst [vmem:[%s844_s25] sm:$0xff] %v369_v52 }
 0x758   : > { %v704_v10 = vpop.eup %703 }
 0x759   : > { %v450_v54 = vmul.f32 %v704_v10, %v449_v53 }
 0x75b   : > { %v453_v55 = vsel %vm452_vm12, %v450_v54, 0.0 }
 0x75c   : > { %v454_v56 = vadd.f32 %v453_v55, %v429_v39 }
 0x75e   : > { %645 = vst [vmem:[%s769_s20 + $0x8] sm:$0xff] %v454_v56 }
 0x765   : > { %v646_v57 = vld [vmem:[%s769_s20 + $0xb] ss:$0 sm:$0xff] }
 0x766   : > { %v462_v58 = vmul.f32 %v646_v57, %v646_v57  ;;  %v471_v59 = vmul.f32 %v646_v57, %v454_v56 }
 0x768   : > { %463 = vadd.xlane.f32.xlu1 %v462_v58 }
 0x76c   : > { %472 = vadd.xlane.f32.xlu1 %v471_v59 }
 0x7f5   : > { %v464_v61 = vpop.xlane.xlu1 %463 }
 0x7f6   : > { %v465_v62 = vsub.f32 %v647_v60, %v464_v61 }
 0x7f8   : > { %705 = vrsqrt.f32 %v465_v62 }
 0x7f9   : > { %v473_v63 = vpop.xlane.xlu1 %472 }
 0x7fa   : > { %v474_v0 = vsub.f32 %v781_v15, %v473_v63 }
 0x802   : > { %v706_v1 = vpop.eup %705 }
 0x803   : > { %v475_v2 = vmul.f32 %v706_v1, %v474_v0 }
 0x805   : > { %v478_v3 = vsel %vm477_vm5, %v475_v2, 0.0 }
 0x806   : > { %v479_v4 = vadd.f32 %v478_v3, %v454_v56 }
 0x808   : > { %650 = vst [vmem:[%s769_s20 + $0x8] sm:$0xff] %v479_v4  ;;  %523 = vst [vmem:[%s844_s25 + $0x8] sm:$0xff] %v479_v4 }
 0x809 PF: > { %s7_s8 = sadd.s32 1, %s729_s8   ;;  %s869_s6 = smov %s725_s7 }
 0x80a   : > { %p4_p5 = scmp.ge.s32.totalorder %s7_s8, 4   ;;  %s870_s7 = smov %s872_s10 }
 0x80c   :  { %6 = sbr.rel (!%p4_p5) target bundleno = 2 (0x2), region = 177 }

// kernel: custom-call.7
= control target key start
LH: loop header
LB: loop body
LE: loop exit
PB: predicated region body
PF: predicated region fallthrough
CT: control target
= control target key end

     0   :  { %s496_s6 = smov 0   ;;  %s498_s7 = smov 0   ;;  %s577_s0 = inlined_call_operand.vmem [shape: f32[2,1,12,12], index: 0, kind: input, shape index: {}]   ;;  %s578_s1 = inlined_call_operand.vmem [shape: f32[2,1,12,12], index: 1, kind: output, shape index: {}]  }
   0x1   :  { %s500_s8 = smov 0  }
   0x2 LB: > { %s412_s9 = sadd.s32 4294967295, %s482_s8   ;;  %s33_s10 = sadd.s32 1, %s478_s7  ;;  %s482_s8 = sphi %s500_s8, %s7_s8   ;;  %s478_s7 = sphi %s498_s7, %s580_s7   ;;  %s474_s6 = sphi %s496_s6, %s579_s6  }
   0x3   : > { %p35_p0 = scmp.ge.s32.totalorder %s33_s10, 2  ;;  %p414_p1 = scmp.ge.s32.totalorder %s482_s8, 2 }
   0x4   : > { %s49_s11 = sand.u32 (!%p414_p1), 1, %s482_s8   ;;  %s428_s12 = sshll.u32 (!%p414_p1), %s478_s7, 4 }
   0x5   : > { %s582_s10 = smov (%p35_p0, %s33_s10), 0  ;;  %47 = sbr.rel (%p414_p1) target bundleno = 12 (0xc), region = 16 }
   0x6   : > { %s415_s13 = sshll.u32 (!%p414_p1), %s49_s11, 4  ;;  %s58_s16 = scalar_lea.vmem (!%p414_p1), %s577_s0, %s428_s12 }
   0x7   : > { %v88_v0 = vld [vmem:[%s58_s16] sm:$0xff] (!%p414_p1)  ;;  %v90_v1 = vld [vmem:[%s58_s16 + $0x8] sm:$0xff] (!%p414_p1)  ;;  %s51_s17 = scalar_lea.vmem (!%p414_p1), [#allocation0], %s415_s13 }
   0x8   : > { %89 = vst [vmem:[%s51_s17] sm:$0xff] (!%p414_p1), %v88_v0  ;;  %91 = vst [vmem:[%s51_s17 + $0x8] sm:$0xff] (!%p414_p1), %v90_v1 }
   0xc PF: > { %p418_p2 = scmp.ge.s32.totalorder %s482_s8, 1  ;;  %p96_p3 = scmp.lt.s32.totalorder %s482_s8, 3 }
   0xe   : > { %p97_p4 = pnand %p418_p2, %p96_p3 }
  0x10   : > { %100 = sbr.rel (%p97_p4) target bundleno = 1793 (0x701), region = 54 }
  0x17   : > { %s103_s18 = sand.u32 1, %s412_s9   ;;  %v114_v2 = vlaneseq  ;;  %v484_v11 = vmov -1.0   ;;  %v485_v55 = vmov 0.0   ;;  %s429_s21 = sshll.u32 %s474_s6, 4 }
  0x18   : > { %s419_s19 = sshll.u32 %s103_s18, 4  ;;  %s312_s24 = scalar_lea.vmem %s578_s1, %s429_s21 }
  0x19   : > { %v523_v3 = vand.u32 127, %v114_v2  ;;  %v118_v4 = vshrl.u32 %v114_v2, 7  ;;  %s525_s20 = scalar_lea.vmem [#allocation0], %s419_s19 }
  0x1a   : > { %v121_v5 = vld [vmem:[%s525_s20] sm:$0xff]  ;;  %v421_v38 = vld [vmem:[%s525_s20 + $0x8] sm:$0xff] }
  0x1b   : > { %vm120_vm0 = vcmp.eq.s32.totalorder %v118_v4, %v523_v3  ;;  %vm116_vm1 = vcmp.lt.s32.totalorder %v523_v3, 12  ;;  %vm125_vm2 = vcmp.ge.s32.totalorder %v118_v4, %v523_v3  ;;  %vm155_vm4 = vcmp.eq.s32.totalorder %v523_v3, 0 }
  0x1c   : > { %v122_v6 = vsel %vm120_vm0, %v121_v5, 0.0  ;;  %vm126_vm3 = vmand %vm125_vm2, %vm116_vm1  ;;  %vm152_vm5 = vcmp.eq.s32.totalorder %v523_v3, %v118_v4  ;;  %v156_v12 = vsel %vm155_vm4, 1.0, %v484_v11  ;;  %vm170_vm6 = vcmp.eq.s32.totalorder %v523_v3, 1 }
  0x1d   : > { %123 = vadd.xlane.f32.xlu0 %v122_v6  ;;  %v127_v8 = vsel %vm126_vm3, %v121_v5, 0.0  ;;  %v157_v13 = vsel %vm152_vm5, %v156_v12, 0.0  ;;  %vm180_vm7 = vcmp.eq.s32.totalorder %v523_v3, 2  ;;  %vm190_vm8 = vcmp.eq.s32.totalorder %v523_v3, 3 }
  0x1e   : > { %vm200_vm9 = vcmp.eq.s32.totalorder %v523_v3, 4  ;;  %v135_v33 = vadd.s32 8, %v118_v4  ;;  %vm210_vm11 = vcmp.eq.s32.totalorder %v523_v3, 5  ;;  %vm220_vm14 = vcmp.eq.s32.totalorder %v523_v3, 6 }
  0x1f   : > { %vm230_vm0 = vcmp.eq.s32.totalorder %v523_v3, 7  ;;  %vm254_vm2 = vcmp.eq.s32.totalorder %v523_v3, 9  ;;  %vm268_vm3 = vcmp.eq.s32.totalorder %v523_v3, 10  ;;  %vm282_vm4 = vcmp.eq.s32.totalorder %v523_v3, 11 }
  0x20   : > { %vm136_vm10 = vcmp.eq.s32.totalorder %v135_v33, %v523_v3  ;;  %vm141_vm12 = vcmp.ge.s32.totalorder %v135_v33, %v523_v3  ;;  %vm163_vm15 = vcmp.eq.s32.totalorder %v523_v3, %v135_v33 }
  0x21   : > { %v138_v39 = vsel %vm136_vm10, %v421_v38, 0.0  ;;  %vm142_vm13 = vmand %vm141_vm12, %vm116_vm1  ;;  %v164_v56 = vsel %vm163_vm15, -1.0, %v485_v55  ;;  %vm240_vm1 = vcmp.eq.s32.totalorder %v523_v3, 8 }
  0x22   : > { %v143_v46 = vsel %vm142_vm13, %v421_v38, 0.0 }
  0xaa   : > { %v529_v7 = vpop.xlane.xlu0 %123 }
  0xab   : > { %456 = vrcp.f32 %v529_v7 }
  0xb5   : > { %v536_v9 = vpop.eup %456 }
  0xb6   : > { %v129_v10 = vmul.f32 %v536_v9, %v127_v8 }
  0xb8   : > { %130 = vst [vmem:[#allocation2] sm:$0xff] %v129_v10 }
  0xbf   : > { %v166_v14 = vld [vmem:[#allocation2 + $0x1] ss:$0 sm:$0xff]  ;;  %v176_v17 = vld [vmem:[#allocation2 + $0x2] ss:$0 sm:$0xff]  ;;  %v186_v22 = vld [vmem:[#allocation2 + $0x3] ss:$0 sm:$0xff] }
  0xc0   : > { %v167_v15 = vxor.u32 2147483648, %v166_v14  ;;  %v177_v19 = vxor.u32 2147483648, %v176_v17  ;;  %v187_v24 = vxor.u32 2147483648, %v186_v22  ;;  %v196_v27 = vld [vmem:[#allocation2 + $0x4] ss:$0 sm:$0xff] }
  0xc1   : > { %v197_v29 = vxor.u32 2147483648, %v196_v27  ;;  %v206_v32 = vld [vmem:[#allocation2 + $0x5] ss:$0 sm:$0xff]  ;;  %v216_v40 = vld [vmem:[#allocation2 + $0x6] ss:$0 sm:$0xff] }
  0xc2   : > { %v171_v16 = vmul.f32 %v167_v15, %v157_v13  ;;  %v207_v35 = vxor.u32 2147483648, %v206_v32  ;;  %v217_v42 = vxor.u32 2147483648, %v216_v40  ;;  %v226_v49 = vld [vmem:[#allocation2 + $0x7] ss:$0 sm:$0xff] }
  0xc3   : > { %v227_v52 = vxor.u32 2147483648, %v226_v49 }
  0xc4   : > { %172 = vadd.xlane.f32.xlu0 %v171_v16 }
 0x151   : > { %v173_v18 = vpop.xlane.xlu0 %172 }
 0x152   : > { %v174_v20 = vsel %vm170_vm6, %v173_v18, %v157_v13  ;;  %vm293_vm6 = vweird.f32 %v529_v7 }
 0x153   : > { %v181_v21 = vmul.f32 %v177_v19, %v174_v20 }
 0x155   : > { %182 = vadd.xlane.f32.xlu1 %v181_v21 }
 0x1e2   : > { %v183_v23 = vpop.xlane.xlu1 %182 }
 0x1e3   : > { %v184_v25 = vsel %vm180_vm7, %v183_v23, %v174_v20 }
 0x1e4   : > { %v191_v26 = vmul.f32 %v187_v24, %v184_v25 }
 0x1e6   : > { %192 = vadd.xlane.f32.xlu1 %v191_v26 }
 0x273   : > { %v193_v28 = vpop.xlane.xlu1 %192 }
 0x274   : > { %v194_v30 = vsel %vm190_vm8, %v193_v28, %v184_v25 }
 0x275   : > { %v201_v31 = vmul.f32 %v197_v29, %v194_v30 }
 0x277   : > { %202 = vadd.xlane.f32.xlu0 %v201_v31 }
 0x304   : > { %v203_v34 = vpop.xlane.xlu0 %202 }
 0x305   : > { %v204_v36 = vsel %vm200_vm9, %v203_v34, %v194_v30 }
 0x306   : > { %v211_v37 = vmul.f32 %v207_v35, %v204_v36 }
 0x308   : > { %212 = vadd.xlane.f32.xlu1 %v211_v37 }
 0x30c   : > { %139 = vadd.xlane.f32.xlu1 %v138_v39 }
 0x395   : > { %v213_v41 = vpop.xlane.xlu1 %212 }
 0x396   : > { %v214_v43 = vsel %vm210_vm11, %v213_v41, %v204_v36 }
 0x397   : > { %v221_v44 = vmul.f32 %v217_v42, %v214_v43 }
 0x399   : > { %222 = vadd.xlane.f32.xlu0 %v221_v44  ;;  %v548_v45 = vpop.xlane.xlu1 %139 }
 0x39a   : > { %458 = vrcp.f32 %v548_v45  ;;  %vm298_vm5 = vweird.f32 %v548_v45 }
 0x3a4   : > { %v459_v47 = vpop.eup %458 }
 0x3a5   : > { %v145_v48 = vmul.f32 %v459_v47, %v143_v46 }
 0x3a7   : > { %146 = vst [vmem:[#allocation2 + $0x8] sm:$0xff] %v145_v48 }
 0x3ae   : > { %v236_v50 = vld [vmem:[#allocation2 + $0x8] ss:$0 sm:$0xff]  ;;  %v250_v61 = vld [vmem:[#allocation2 + $0x9] ss:$0 sm:$0xff]  ;;  %v264_v6 = vld [vmem:[#allocation2 + $0xa] ss:$0 sm:$0xff] }
 0x3af   : > { %v237_v53 = vxor.u32 2147483648, %v236_v50  ;;  %v251_v0 = vxor.u32 2147483648, %v250_v61  ;;  %v265_v11 = vxor.u32 2147483648, %v264_v6  ;;  %v278_v16 = vld [vmem:[#allocation2 + $0xb] ss:$0 sm:$0xff] }
 0x3b0   : > { %v279_v19 = vxor.u32 2147483648, %v278_v16 }
 0x3b1   : > { %v245_v58 = vmul.f32 %v237_v53, %v164_v56 }
 0x426   : > { %v223_v51 = vpop.xlane.xlu0 %222 }
 0x427   : > { %v224_v54 = vsel %vm220_vm14, %v223_v51, %v214_v43 }
 0x428   : > { %v231_v57 = vmul.f32 %v227_v52, %v224_v54 }
 0x42a   : > { %232 = vadd.xlane.f32.xlu0 %v231_v57 }
 0x42e   : > { %246 = vadd.xlane.f32.xlu0 %v245_v58 }
 0x4b7   : > { %v233_v59 = vpop.xlane.xlu0 %232 }
 0x4b8   : > { %v234_v60 = vsel %vm230_vm0, %v233_v59, %v224_v54 }
 0x4b9   : > { %v241_v62 = vmul.f32 %v237_v53, %v234_v60 }
 0x4bb   : > { %v247_v63 = vpop.xlane.xlu0 %246  ;;  %242 = vadd.xlane.f32.xlu1 %v241_v62 }
 0x4bc   : > { %v248_v1 = vsel %vm240_vm1, %v247_v63, %v164_v56 }
 0x4bd   : > { %v259_v2 = vmul.f32 %v251_v0, %v248_v1 }
 0x4bf   : > { %260 = vadd.xlane.f32.xlu0 %v259_v2 }
 0x548   : > { %v243_v4 = vpop.xlane.xlu1 %242 }
 0x549   : > { %v244_v5 = vsel %vm240_vm1, %v243_v4, %v234_v60 }
 0x54a   : > { %v255_v8 = vmul.f32 %v251_v0, %v244_v5 }
 0x54c   : > { %v261_v10 = vpop.xlane.xlu0 %260  ;;  %256 = vadd.xlane.f32.xlu1 %v255_v8 }
 0x54d   : > { %v262_v12 = vsel %vm254_vm2, %v261_v10, %v248_v1 }
 0x54e   : > { %v273_v13 = vmul.f32 %v265_v11, %v262_v12 }
 0x550   : > { %274 = vadd.xlane.f32.xlu0 %v273_v13 }
 0x5d9   : > { %v257_v14 = vpop.xlane.xlu1 %256 }
 0x5da   : > { %v258_v15 = vsel %vm254_vm2, %v257_v14, %v244_v5 }
 0x5db   : > { %v269_v17 = vmul.f32 %v265_v11, %v258_v15 }
 0x5dd   : > { %v275_v18 = vpop.xlane.xlu0 %274  ;;  %270 = vadd.xlane.f32.xlu1 %v269_v17 }
 0x5de   : > { %v276_v20 = vsel %vm268_vm3, %v275_v18, %v262_v12 }
 0x5df   : > { %v287_v21 = vmul.f32 %v279_v19, %v276_v20 }
 0x5e1   : > { %288 = vadd.xlane.f32.xlu0 %v287_v21 }
 0x66a   : > { %v271_v22 = vpop.xlane.xlu1 %270 }
 0x66b   : > { %v272_v23 = vsel %vm268_vm3, %v271_v22, %v258_v15 }
 0x66c   : > { %v283_v24 = vmul.f32 %v279_v19, %v272_v23 }
 0x66e   : > { %v289_v25 = vpop.xlane.xlu0 %288  ;;  %284 = vadd.xlane.f32.xlu1 %v283_v24 }
 0x66f   : > { %v290_v26 = vsel %vm282_vm4, %v289_v25, %v276_v20 }
 0x670   : > { %v297_v27 = vmul.f32 %v459_v47, %v290_v26 }
 0x672   : > { %v299_v28 = vsel %vm298_vm5, %v290_v26, %v297_v27 }
 0x673   : > { %345 = vst [vmem:[%s312_s24 + $0x8] sm:$0xff] %v299_v28 }
 0x6fb   : > { %v285_v29 = vpop.xlane.xlu1 %284 }
 0x6fc   : > { %v286_v30 = vsel %vm282_vm4, %v285_v29, %v272_v23 }
 0x6fd   : > { %v292_v31 = vmul.f32 %v536_v9, %v286_v30 }
 0x6ff   : > { %v294_v3 = vsel %vm293_vm6, %v286_v30, %v292_v31 }
 0x700   : > { %343 = vst [vmem:[%s312_s24] sm:$0xff] %v294_v3 }
 0x701 PF: > { %s7_s8 = sadd.s32 1, %s482_s8   ;;  %s579_s6 = smov %s478_s7 }
 0x702   : > { %p4_p5 = scmp.ge.s32.totalorder %s7_s8, 4   ;;  %s580_s7 = smov %s582_s10 }
 0x704   :  { %6 = sbr.rel (!%p4_p5) target bundleno = 2 (0x2), region = 132 }

// kernel: least_squares_coeffs.1
= control target key start
LH: loop header
LB: loop body
LE: loop exit
PB: predicated region body
PF: predicated region fallthrough
CT: control target
= control target key end

     0   :  { %s602_s6 = smov 0   ;;  %s604_s7 = smov 0   ;;  %s673_s0 = inlined_call_operand.vmem [shape: f32[2,256,13], index: 0, kind: input, shape index: {}]   ;;  %s674_s1 = inlined_call_operand.vmem [shape: f32[2,13,13], index: 1, kind: output, shape index: {}]  }
   0x1   :  { %s606_s8 = smov 0  }
   0x2 LB: > { %s23_s9 = sadd.s32 1, %s585_s7  ;;  %p405_p0 = scmp.ge.s32.totalorder %s589_s8, 1  ;;  %s589_s8 = sphi %s606_s8, %s11_s8   ;;  %s585_s7 = sphi %s604_s7, %s676_s7   ;;  %s581_s6 = sphi %s602_s6, %s675_s6  }
   0x3   : > { %p25_p1 = scmp.ge.s32.totalorder %s23_s9, 2  ;;  %p106_p2 = scmp.lt.s32.totalorder %s589_s8, 3 }
   0x5   : > { %s678_s9 = smov (%p25_p1, %s23_s9), 0  ;;  %p107_p3 = pnand %p405_p0, %p106_p2 }
   0x6   : > { %p131_p4 = scmp.lt.s32.totalorder (!%p107_p3), %s581_s6, 1  ;;  %vm149_vm0 = vcmask (!%p107_p3), 105472   ;;  %vm151_vm1 = vcmask (!%p107_p3), 102400  }
   0x7   : > { %110 = sbr.rel (%p107_p3) target bundleno = 375 (0x177), region = 24 }
   0xe   : > { %s680_s6 = smov (!%p131_p4, %s581_s6), 1 }
   0xf   : > { %s412_s10 = sshll.u32 %s680_s6, 8  ;;  %s413_s14 = sshll.u32 %s680_s6, 4 }
  0x10   : > { %s626_s13 = scalar_lea.vmem %s673_s0, %s412_s10  ;;  %s144_s17 = scalar_lea.vmem %s674_s1, %s413_s14 }
  0x11   : > { %v153_v0 = vld [vmem:[%s626_s13] sm:$0xff]  ;;  %v154_v2 = vld [vmem:[%s626_s13 + $0x8] sm:$0xff]  ;;  %v171_v6 = vld [vmem:[%s626_s13 + $0x90] sm:$0xff] }
  0x12   : > { %v169_v1 = vld [vmem:[%s626_s13 + $0x80] sm:$0xff]  ;;  %v170_v4 = vld [vmem:[%s626_s13 + $0x88] sm:$0xff]  ;;  %v454_v5 = vpack.c.bf16 %v154_v2, %v153_v0  ;;  %v172_v7 = vld [vmem:[%s626_s13 + $0x98] sm:$0xff] }
  0x13   : > { %v525_v3 = vpack.i.bf16 %v153_v0, %v169_v1  ;;  %v452_v8 = vpack.c.bf16 %v170_v4, %v169_v1  ;;  %v527_v9 = vpack.i.bf16 %v154_v2, %v170_v4  ;;  %v456_v10 = vpack.c.bf16 %v172_v7, %v171_v6  ;;  %v155_v11 = vld [vmem:[%s626_s13 + $0x10] sm:$0xff]  ;;  %v156_v12 = vld [vmem:[%s626_s13 + $0x18] sm:$0xff]  ;;  %v173_v14 = vld [vmem:[%s626_s13 + $0xa0] sm:$0xff] }
  0x14   : > { %v458_v13 = vpack.c.bf16 %v156_v12, %v155_v11  ;;  %v174_v15 = vld [vmem:[%s626_s13 + $0xa8] sm:$0xff]  ;;  %v529_v17 = vpack.i.bf16 %v155_v11, %v171_v6  ;;  %v157_v18 = vld [vmem:[%s626_s13 + $0x20] sm:$0xff]  ;;  %v175_v21 = vld [vmem:[%s626_s13 + $0xb0] sm:$0xff]  ;;  %v531_v24 = vpack.i.bf16 %v156_v12, %v172_v7  ;;  %v591_v6 = vmov 0.0  }
  0x15   : > { %526 = vxpose.xlu0.b32.start [1/16] (narrow) %v525_v3, 16  ;;  %453 = vmatprep.subr.bf16.mxu0 %v452_v8  ;;  %v460_v16 = vpack.c.bf16 %v174_v15, %v173_v14  ;;  %v158_v19 = vld [vmem:[%s626_s13 + $0x28] sm:$0xff]  ;;  %v176_v22 = vld [vmem:[%s626_s13 + $0xb8] sm:$0xff]  ;;  %v159_v25 = vld [vmem:[%s626_s13 + $0x30] sm:$0xff]  ;;  %v533_v31 = vpack.i.bf16 %v157_v18, %v173_v14  ;;  %150 = vst.msk [vmem:[%s144_s17] sm:$0xff] %vm149_vm0, %v591_v6 }
  0x16   : > { %455 = vmatpush3.bf16.msra.mxu0 %v454_v5  ;;  %484 = vmatprep.subr.bf16.mxu1 %v452_v8  ;;  %v462_v20 = vpack.c.bf16 %v158_v19, %v157_v18  ;;  %v464_v23 = vpack.c.bf16 %v176_v22, %v175_v21  ;;  %v160_v26 = vld [vmem:[%s626_s13 + $0x38] sm:$0xff]  ;;  %v177_v28 = vld [vmem:[%s626_s13 + $0xc0] sm:$0xff]  ;;  %v178_v29 = vld [vmem:[%s626_s13 + $0xc8] sm:$0xff]  ;;  %v535_v38 = vpack.i.bf16 %v158_v19, %v174_v15 }
  0x17   : > { %457 = vmatprep.subr.bf16.mxu0 %v456_v10  ;;  %492 = vmatpush3.bf16.msra.mxu1 %v454_v5  ;;  %v466_v27 = vpack.c.bf16 %v160_v26, %v159_v25  ;;  %v468_v30 = vpack.c.bf16 %v178_v29, %v177_v28  ;;  %v161_v32 = vld [vmem:[%s626_s13 + $0x40] sm:$0xff]  ;;  %v162_v33 = vld [vmem:[%s626_s13 + $0x48] sm:$0xff]  ;;  %v179_v35 = vld [vmem:[%s626_s13 + $0xd0] sm:$0xff]  ;;  %v537_v45 = vpack.i.bf16 %v159_v25, %v175_v21 }
  0x18   : > { %485 = vmatprep.subr.bf16.mxu1 %v456_v10  ;;  %v470_v34 = vpack.c.bf16 %v162_v33, %v161_v32  ;;  %v180_v36 = vld [vmem:[%s626_s13 + $0xd8] sm:$0xff]  ;;  %v163_v39 = vld [vmem:[%s626_s13 + $0x50] sm:$0xff]  ;;  %v181_v42 = vld [vmem:[%s626_s13 + $0xe0] sm:$0xff]  ;;  %v539_v52 = vpack.i.bf16 %v160_v26, %v176_v22  ;;  %v541_v56 = vpack.i.bf16 %v161_v32, %v177_v28  ;;  %v543_v57 = vpack.i.bf16 %v162_v33, %v178_v29 }
  0x19   : > { %528 = vxpose.xlu0.b32.cont [2/16] (narrow) %v527_v9, 16  ;;  %v472_v37 = vpack.c.bf16 %v180_v36, %v179_v35  ;;  %v164_v40 = vld [vmem:[%s626_s13 + $0x58] sm:$0xff]  ;;  %v182_v43 = vld [vmem:[%s626_s13 + $0xe8] sm:$0xff]  ;;  %v165_v46 = vld [vmem:[%s626_s13 + $0x60] sm:$0xff]  ;;  %v545_v58 = vpack.i.bf16 %v163_v39, %v179_v35  ;;  %152 = vst.msk [vmem:[%s144_s17 + $0x8] sm:$0x1f] %vm151_vm1, %v591_v6 }
  0x1a   : > { %459 = vmatpush3.bf16.msra.mxu0 %v458_v13  ;;  %v474_v41 = vpack.c.bf16 %v164_v40, %v163_v39  ;;  %v476_v44 = vpack.c.bf16 %v182_v43, %v181_v42  ;;  %v166_v47 = vld [vmem:[%s626_s13 + $0x68] sm:$0xff]  ;;  %v183_v49 = vld [vmem:[%s626_s13 + $0xf0] sm:$0xff]  ;;  %v184_v50 = vld [vmem:[%s626_s13 + $0xf8] sm:$0xff]  ;;  %v547_v59 = vpack.i.bf16 %v164_v40, %v180_v36  ;;  %v549_v60 = vpack.i.bf16 %v165_v46, %v181_v42 }
  0x1b   : > { %461 = vmatprep.subr.bf16.mxu0 %v460_v16  ;;  %493 = vmatpush3.bf16.msra.mxu1 %v458_v13  ;;  %v478_v48 = vpack.c.bf16 %v166_v47, %v165_v46  ;;  %v480_v51 = vpack.c.bf16 %v184_v50, %v183_v49  ;;  %v167_v53 = vld [vmem:[%s626_s13 + $0x70] sm:$0xff]  ;;  %v168_v54 = vld [vmem:[%s626_s13 + $0x78] sm:$0xff]  ;;  %v551_v61 = vpack.i.bf16 %v166_v47, %v182_v43 }
  0x1c   : > { %486 = vmatprep.subr.bf16.mxu1 %v460_v16  ;;  %v482_v55 = vpack.c.bf16 %v168_v54, %v167_v53  ;;  %v553_v62 = vpack.i.bf16 %v167_v53, %v183_v49  ;;  %v555_v63 = vpack.i.bf16 %v168_v54, %v184_v50  ;;  %v185_v8 = vld [vmem:[%s144_s17] sm:$0xff] }
  0x1d   : > { %530 = vxpose.xlu0.b32.cont [3/16] (narrow) %v529_v17, 16 }
  0x1e   : > { %463 = vmatpush3.bf16.msra.mxu0 %v462_v20 }
  0x1f   : > { %465 = vmatprep.subr.bf16.mxu0 %v464_v23  ;;  %494 = vmatpush3.bf16.msra.mxu1 %v462_v20 }
  0x20   : > { %487 = vmatprep.subr.bf16.mxu1 %v464_v23  ;;  %v186_v13 = vld [vmem:[%s144_s17 + $0x8] sm:$0x1f] }
  0x21   : > { %532 = vxpose.xlu0.b32.cont [4/16] (narrow) %v531_v24, 16 }
  0x22   : > { %467 = vmatpush3.bf16.msra.mxu0 %v466_v27 }
  0x23   : > { %469 = vmatprep.subr.bf16.mxu0 %v468_v30  ;;  %495 = vmatpush3.bf16.msra.mxu1 %v466_v27 }
  0x24   : > { %488 = vmatprep.subr.bf16.mxu1 %v468_v30 }
  0x25   : > { %534 = vxpose.xlu0.b32.cont [5/16] (narrow) %v533_v31, 16 }
  0x26   : > { %471 = vmatpush3.bf16.msra.mxu0 %v470_v34 }
  0x27   : > { %473 = vmatprep.subr.bf16.mxu0 %v472_v37  ;;  %496 = vmatpush3.bf16.msra.mxu1 %v470_v34 }
  0x28   : > { %489 = vmatprep.subr.bf16.mxu1 %v472_v37 }
  0x29   : > { %536 = vxpose.xlu0.b32.cont [6/16] (narrow) %v535_v38, 16 }
  0x2a   : > { %475 = vmatpush3.bf16.msra.mxu0 %v474_v41 }
  0x2b   : > { %477 = vmatprep.subr.bf16.mxu0 %v476_v44  ;;  %497 = vmatpush3.bf16.msra.mxu1 %v474_v41 }
  0x2c   : > { %490 = vmatprep.subr.bf16.mxu1 %v476_v44 }
  0x2d   : > { %538 = vxpose.xlu0.b32.cont [7/16] (narrow) %v537_v45, 16 }
  0x2e   : > { %479 = vmatpush3.bf16.msra.mxu0 %v478_v48 }
  0x2f   : > { %481 = vmatprep.subr.bf16.mxu0 %v480_v51  ;;  %498 = vmatpush3.bf16.msra.mxu1 %v478_v48 }
  0x30   : > { %491 = vmatprep.subr.bf16.mxu1 %v480_v51 }
  0x31   : > { %540 = vxpose.xlu0.b32.cont [8/16] (narrow) %v539_v52, 16 }
  0x32   : > { %483 = vmatpush3.bf16.msra.mxu0 %v482_v55 }
  0x33   : > { %499 = vmatpush3.bf16.msra.mxu1 %v482_v55 }
  0x35   : > { %542 = vxpose.xlu0.b32.cont [9/16] (narrow) %v541_v56, 16 }
  0x39   : > { %544 = vxpose.xlu0.b32.cont [10/16] (narrow) %v543_v57, 16 }
  0x3d   : > { %546 = vxpose.xlu0.b32.cont [11/16] (narrow) %v545_v58, 16 }
  0x41   : > { %548 = vxpose.xlu0.b32.cont [12/16] (narrow) %v547_v59, 16 }
  0x45   : > { %550 = vxpose.xlu0.b32.cont [13/16] (narrow) %v549_v60, 16 }
  0x49   : > { %552 = vxpose.xlu0.b32.cont [14/16] (narrow) %v551_v61, 16 }
  0x4d   : > { %554 = vxpose.xlu0.b32.cont [15/16] (narrow) %v553_v62, 16 }
  0x51   : > { %556 = vxpose.xlu0.b32.end [16/16] (narrow) %v555_v63, 16 }
  0x95   : > { %v557_v0 = vpop.trf.xlu0 }
  0x96   : > { %v558_v1 = vunpack.i.l.bf16 %v557_v0  ;;  %v561_v2 = vunpack.i.h.bf16 %v557_v0 }
  0x98   : > { %315 = vmatprep.mubr.f32.mxu0 %v558_v1 }
  0x99   : > { %v562_v3 = vpop.trf.xlu0  ;;  %316 = vmatmul.mubr.f32.vlgmr.msra.gmra.mrb[0].mxu0 %v561_v2 }
  0x9a   : > { %v566_v4 = vunpack.i.h.bf16 %v562_v3  ;;  %v563_v5 = vunpack.i.l.bf16 %v562_v3 }
  0x9c   : > { %320 = vmatprep.mubr.f32.mxu1 %v563_v5 }
  0x9d   : > { %321 = vmatmul.mubr.f32.vlgmr.msra.gmra.mrb[0].mxu1 %v566_v4 }
 0x16c   : > { %v446_v7 = vpop.f32.mrb[0].mxu0 }
 0x16d   : > { %v447_v9 = vpop.f32.mrb[1].mxu0 }
 0x16e   : > { %v448_v10 = vadd.f32 %v447_v9, %v446_v7 }
 0x170   : > { %v326_v11 = vadd.f32 %v448_v10, %v185_v8  ;;  %v449_v12 = vpop.f32.mrb[0].mxu1 }
 0x171   : > { %v450_v14 = vpop.f32.mrb[1].mxu1 }
 0x172   : > { %329 = vst.msk [vmem:[%s144_s17] sm:$0xff] %vm149_vm0, %v326_v11  ;;  %v451_v15 = vadd.f32 %v450_v14, %v449_v12 }
 0x174   : > { %v327_v16 = vadd.f32 %v451_v15, %v186_v13 }
 0x176   : > { %331 = vst.msk [vmem:[%s144_s17 + $0x8] sm:$0x1f] %vm151_vm1, %v327_v16 }
 0x177 PF: > { %s11_s8 = sadd.s32 1, %s589_s8   ;;  %s675_s6 = smov %s585_s7 }
 0x178   : > { %p8_p5 = scmp.ge.s32.totalorder %s11_s8, 4   ;;  %s676_s7 = smov %s678_s9 }
 0x17a   :  { %10 = sbr.rel (!%p8_p5) target bundleno = 2 (0x2), region = 58 }

</bundles_post_ra>
